<compile_context>
chip_gen: v7x
topology: tpu7x:2x2x1
jax: 0.10.0
libtpu: 0.0.40
codegen_flags: <defaults>
</compile_context>

<pallas_src>
from functools import partial

import jax
import jax.numpy as jnp
from jax import lax
from jax.experimental import pallas as pl
from jax.experimental.pallas import tpu as pltpu


def _hybrid_embed_kernel(x_ref, w_ref, wt_ref, bc_ref, br_ref,
                         y_ref, g_ref, xsum_ref, *, inv_hw):
    """One (batch, spatial-tile) grid step.

    x_ref   : (1, C, T)   backbone feature tile
    w_ref   : (E, C)      1x1-conv weight
    wt_ref  : (C, E)      transposed weight (for the lane-dense global mean)
    bc_ref  : (E, 1)      bias, column layout (broadcast over spatial lanes)
    br_ref  : (1, E)      bias, row layout (for the lane-dense global mean)
    y_ref   : (1, E, T)   projected feature tile
    g_ref   : (1, 1, E)   global mean row (written on the last spatial tile)
    xsum_ref: (1, C) f32  running spatial sum of x across the inner grid axis
    """
    s = pl.program_id(1)

    @pl.when(s == 0)
    def _init():
        xsum_ref[...] = jnp.zeros_like(xsum_ref)

    x = x_ref[0]                                                    # (C, T)

    # 1x1 conv == channel matmul on the MXU, f32 accumulation.
    y = jnp.dot(w_ref[...], x, preferred_element_type=jnp.float32)  # (E, T)
    y = y + bc_ref[...].astype(jnp.float32)
    y_ref[0] = y.astype(y_ref.dtype)

    # Per-tile spatial sum of x as a lane-dense (1, C) row, done on the MXU
    # (ones @ x^T) so the reduction stays off the XLU/VPU (MXU has slack:
    # this kernel is HBM-bandwidth-bound).
    ones_row = jnp.ones((1, x.shape[-1]), dtype=x.dtype)
    tile_sum = lax.dot_general(ones_row, x, (((1,), (1,)), ((), ())),
                               preferred_element_type=jnp.float32)   # (1, C)
    xsum_ref[...] += tile_sum

    @pl.when(s == pl.num_programs(1) - 1)
    def _finalize():
        # mean(W x + b) == W mean(x) + b (the projection is linear), so the
        # global mean is exact under spatial tiling with only a C-sized
        # accumulator.
        xbar = xsum_ref[...] * inv_hw                               # (1, C)
        g = jnp.dot(xbar, wt_ref[...].astype(jnp.float32),
                    preferred_element_type=jnp.float32)             # (1, E)
        g = g + br_ref[...].astype(jnp.float32)
        g_ref[0] = g.astype(g_ref.dtype)


def _pick_hw_tile(hw, c, e, in_bytes, out_bytes, budget_bytes=8 << 20):
    """Largest multiple-of-128 divisor of `hw` whose double-buffered streamed
    footprint (x in + y out) fits `budget_bytes`.  Falls back to the full
    spatial extent (always a legal block dim) when hw is not 128-divisible."""
    if hw % 128 != 0:
        return hw
    per_lane = 2 * (c * in_bytes + e * out_bytes)
    best = 128
    for t in range(128, hw + 1, 128):
        if hw % t == 0 and per_lane * t <= budget_bytes:
            best = t
    return best


def _vmem_limit_bytes(c, e, t, in_bytes, out_bytes):
    """Padded, double-buffered VMEM footprint of all blocks, plus headroom."""
    def padded(rows, cols, nbytes):
        return (-(-rows // 8) * 8) * (-(-cols // 128) * 128) * nbytes

    streamed = 2 * (padded(c, t, in_bytes) + padded(e, t, out_bytes))
    resident = 2 * (padded(e, c, in_bytes) + padded(c, e, in_bytes)
                    + padded(e, 1, in_bytes) + padded(1, e, in_bytes)
                    + padded(1, e, out_bytes))
    scratch = padded(1, c, 4)
    need = streamed + resident + scratch + (4 << 20)
    return int(min(max(need, 16 << 20), 64 << 20))


def hybrid_embed_proj(feat, proj_weight, proj_bias, *, out_dtype=None):
    """Pallas projection + global pooling of HybridEmbed.

    feat:        (B, C, H, W) backbone feature map (NCHW, PyTorch layout)
    proj_weight: (E, C, 1, 1) or (E, C)  -- Conv2d(kernel_size=1) weight
    proj_bias:   (E,)
    out_dtype:   dtype of the streamed outputs (default: feat.dtype).
    Returns (y, global_y): y (B, E, H, W), global_y (B, E, 1).
    """
    B, C, H, W = feat.shape
    HW = H * W
    E = proj_weight.shape[0]
    out_dtype = feat.dtype if out_dtype is None else jnp.dtype(out_dtype)

    w2 = proj_weight.reshape(E, C).astype(feat.dtype)    # (E, C)
    wt = jnp.transpose(w2)                               # (C, E), tiny, wrapper-side
    b_col = proj_bias.reshape(E, 1).astype(feat.dtype)
    b_row = proj_bias.reshape(1, E).astype(feat.dtype)

    feat_f = feat.reshape(B, C, HW)                      # contiguous view, free

    in_bytes = feat.dtype.itemsize
    out_bytes = out_dtype.itemsize
    thw = _pick_hw_tile(HW, C, E, in_bytes, out_bytes)
    n_hw = HW // thw
    grid = (B, n_hw)

    kernel = partial(_hybrid_embed_kernel, inv_hw=1.0 / HW)

    y, g = pl.pallas_call(
        kernel,
        out_shape=(jax.ShapeDtypeStruct((B, E, HW), out_dtype),
                   jax.ShapeDtypeStruct((B, 1, E), out_dtype)),
        grid=grid,
        in_specs=[
            pl.BlockSpec((1, C, thw), lambda b, s: (b, 0, s)),
            pl.BlockSpec((E, C), lambda b, s: (0, 0)),
            pl.BlockSpec((C, E), lambda b, s: (0, 0)),
            pl.BlockSpec((E, 1), lambda b, s: (0, 0)),
            pl.BlockSpec((1, E), lambda b, s: (0, 0)),
        ],
        out_specs=(
            pl.BlockSpec((1, E, thw), lambda b, s: (b, 0, s)),
            pl.BlockSpec((1, 1, E), lambda b, s: (b, 0, 0)),
        ),
        scratch_shapes=[pltpu.VMEM((1, C), jnp.float32)],
        compiler_params=pltpu.CompilerParams(
            dimension_semantics=("parallel", "arbitrary"),
            vmem_limit_bytes=_vmem_limit_bytes(C, E, thw, in_bytes, out_bytes)),
    )(feat_f, w2, wt, b_col, b_row)

    # (B, 1, E) -> (B, E, 1): identical flat element order, free reshape.
    return y.reshape(B, E, H, W), g.reshape(B, E, 1)


def hybrid_embed(x, proj_weight, proj_bias, *, backbone=None, out_dtype=None):
    """Mirrors HybridEmbed.forward: optional backbone, then 1x1 proj + mean."""
    # TODO(synk): arbitrary torch backbone is not translatable; accept an
    # optional JAX-callable hook (or a precomputed feature map) instead.
    if backbone is not None:
        x = backbone(x)
        if isinstance(x, (list, tuple)):
            x = x[-1]
    return hybrid_embed_proj(x, proj_weight, proj_bias, out_dtype=out_dtype)


def _reference(feat, proj_weight, proj_bias):
    """Pure-JAX reference of HybridEmbed's proj + global mean."""
    B, C, H, W = feat.shape
    E = proj_weight.shape[0]
    w = proj_weight.reshape(E, C)
    y = jnp.einsum("ec,bchw->behw", w, feat) + proj_bias.reshape(1, E, 1, 1)
    g = jnp.mean(y, axis=(2, 3))[:, :, None]
    return y, g


if __name__ == "__main__":
    # The "input" here is the backbone's output feature map (B=2, feature
    # channels C=4, 16x16 spatial), projected to embed_dim=32.
    B, C, H, W, E = 2, 4, 16, 16, 32
    key = jax.random.PRNGKey(0)
    kx, kw, kb = jax.random.split(key, 3)

    feat = jax.random.normal(kx, (B, C, H, W), jnp.float32)
    proj_w = 0.05 * jax.random.normal(kw, (E, C, 1, 1), jnp.float32)
    proj_b = 0.05 * jax.random.normal(kb, (E,), jnp.float32)

    x_out, g_out = hybrid_embed(feat, proj_w, proj_b)
    x_out = jax.block_until_ready(x_out)
    g_out = jax.block_until_ready(g_out)

    x_ref, g_ref = _reference(feat, proj_w, proj_b)
    assert x_out.shape == (B, E, H, W)
    assert g_out.shape == (B, E, 1)
    assert jnp.allclose(x_out, x_ref, atol=1e-5, rtol=1e-5), "proj mismatch"
    assert jnp.allclose(g_out, g_ref, atol=1e-5, rtol=1e-5), "global mismatch"
    print("KERNEL_OK")
</pallas_src>

<mosaic_0001>
module attributes {stable_mosaic.version = 11 : i64} {
  func.func @_hybrid_embed_kernel(%arg0: i32, %arg1: i32, %arg2: memref<1x4x256xf32, #tpu.memory_space<vmem>>, %arg3: memref<32x4xf32, #tpu.memory_space<vmem>>, %arg4: memref<4x32xf32, #tpu.memory_space<vmem>>, %arg5: memref<32x1xf32, #tpu.memory_space<vmem>>, %arg6: memref<1x32xf32, #tpu.memory_space<vmem>>, %arg7: memref<1x32x256xf32, #tpu.memory_space<vmem>>, %arg8: memref<1x1x32xf32, #tpu.memory_space<vmem>>, %arg9: memref<1x4xf32, #tpu.memory_space<vmem>>) attributes {dimension_semantics = [#tpu.dimension_semantics<parallel>, #tpu.dimension_semantics<arbitrary>], iteration_bounds = array<i64: 2, 1>, scalar_prefetch = 0 : i64, scratch_operands = 1 : i64, tpu.core_type = #tpu.core_type<tc>, window_params = [{transform_indices = @transform_0, window_bounds = array<i64: 1, 4, 256>}, {pipeline_mode = #tpu.pipeline_mode<synchronous>, transform_indices = @transform_1, window_bounds = array<i64: 32, 4>}, {pipeline_mode = #tpu.pipeline_mode<synchronous>, transform_indices = @transform_2, window_bounds = array<i64: 4, 32>}, {pipeline_mode = #tpu.pipeline_mode<synchronous>, transform_indices = @transform_3, window_bounds = array<i64: 32, 1>}, {pipeline_mode = #tpu.pipeline_mode<synchronous>, transform_indices = @transform_4, window_bounds = array<i64: 1, 32>}, {transform_indices = @transform_5, window_bounds = array<i64: 1, 32, 256>}, {transform_indices = @transform_6, window_bounds = array<i64: 1, 1, 32>}]} {
    %c0_i32 = arith.constant 0 : i32
    %0 = arith.cmpi eq, %arg1, %c0_i32 : i32
    %1 = arith.extui %0 : i1 to i32
    %c0_i32_0 = arith.constant 0 : i32
    %2 = arith.cmpi ne, %1, %c0_i32_0 : i32
    scf.if %2 {
      %cst_18 = arith.constant 0.000000e+00 : f32
      %21 = vector.broadcast %cst_18 : f32 to vector<1x4xf32>
      %c0_19 = arith.constant 0 : index
      %c0_20 = arith.constant 0 : index
      %22 = vector.load %arg9[%c0_19, %c0_20] : memref<1x4xf32, #tpu.memory_space<vmem>>, vector<1x4xf32>
      tpu.vector_store %arg9[%c0_19, %c0_20], %21 {strides = array<i32>} : memref<1x4xf32, #tpu.memory_space<vmem>>, vector<1x4xf32>,
    } else {
    }
    %c0 = arith.constant 0 : index
    %c0_1 = arith.constant 0 : index
    %c0_2 = arith.constant 0 : index
    %3 = vector.load %arg2[%c0, %c0_1, %c0_2] : memref<1x4x256xf32, #tpu.memory_space<vmem>>, vector<1x4x256xf32>
    %4 = vector.shape_cast %3 : vector<1x4x256xf32> to vector<4x256xf32>
    %c0_3 = arith.constant 0 : index
    %c0_4 = arith.constant 0 : index
    %5 = vector.load %arg3[%c0_3, %c0_4] : memref<32x4xf32, #tpu.memory_space<vmem>>, vector<32x4xf32>
    %cst = arith.constant dense<0.000000e+00> : vector<32x256xf32>
    %6 = tpu.matmul %5, %4, %cst {dimension_numbers = #tpu.dot_dimension_numbers<[1], [0], [0], [1], [0, 0, 1, 1], [], []>} : vector<32x4xf32>, vector<4x256xf32>, vector<32x256xf32> -> vector<32x256xf32>
    %c0_5 = arith.constant 0 : index
    %c0_6 = arith.constant 0 : index
    %7 = vector.load %arg5[%c0_5, %c0_6] : memref<32x1xf32, #tpu.memory_space<vmem>>, vector<32x1xf32>
    %8 = vector.broadcast %7 : vector<32x1xf32> to vector<32x256xf32>
    %9 = arith.addf %6, %8 : vector<32x256xf32>
    %c0_7 = arith.constant 0 : index
    %c0_8 = arith.constant 0 : index
    %c0_9 = arith.constant 0 : index
    %10 = vector.load %arg7[%c0_7, %c0_8, %c0_9] : memref<1x32x256xf32, #tpu.memory_space<vmem>>, vector<1x32x256xf32>
    %11 = vector.shape_cast %10 : vector<1x32x256xf32> to vector<32x256xf32>
    %12 = vector.shape_cast %9 : vector<32x256xf32> to vector<1x32x256xf32>
    tpu.vector_store %arg7[%c0_7, %c0_8, %c0_9], %12 {strides = array<i32>} : memref<1x32x256xf32, #tpu.memory_space<vmem>>, vector<1x32x256xf32>,
    %cst_10 = arith.constant 1.000000e+00 : f32
    %13 = vector.broadcast %cst_10 : f32 to vector<1x256xf32>
    %cst_11 = arith.constant dense<0.000000e+00> : vector<1x4xf32>
    %14 = tpu.matmul %13, %4, %cst_11 {dimension_numbers = #tpu.dot_dimension_numbers<[1], [1], [0], [0], [0, 0, 1, 0], [], []>} : vector<1x256xf32>, vector<4x256xf32>, vector<1x4xf32> -> vector<1x4xf32>
    %c0_12 = arith.constant 0 : index
    %c0_13 = arith.constant 0 : index
    %15 = vector.load %arg9[%c0_12, %c0_13] : memref<1x4xf32, #tpu.memory_space<vmem>>, vector<1x4xf32>
    %16 = arith.addf %15, %14 : vector<1x4xf32>
    %c0_14 = arith.constant 0 : index
    %c0_15 = arith.constant 0 : index
    %17 = vector.load %arg9[%c0_14, %c0_15] : memref<1x4xf32, #tpu.memory_space<vmem>>, vector<1x4xf32>
    tpu.vector_store %arg9[%c0_14, %c0_15], %16 {strides = array<i32>} : memref<1x4xf32, #tpu.memory_space<vmem>>, vector<1x4xf32>,
    %c0_i32_16 = arith.constant 0 : i32
    %18 = arith.cmpi eq, %arg1, %c0_i32_16 : i32
    %19 = arith.extui %18 : i1 to i32
    %c0_i32_17 = arith.constant 0 : i32
    %20 = arith.cmpi ne, %19, %c0_i32_17 : i32
    scf.if %20 {
      %c0_18 = arith.constant 0 : index
      %c0_19 = arith.constant 0 : index
      %21 = vector.load %arg9[%c0_18, %c0_19] : memref<1x4xf32, #tpu.memory_space<vmem>>, vector<1x4xf32>
      %cst_20 = arith.constant 3.906250e-03 : f32
      %22 = vector.broadcast %cst_20 : f32 to vector<1x4xf32>
      %23 = arith.mulf %21, %22 : vector<1x4xf32>
      %c0_21 = arith.constant 0 : index
      %c0_22 = arith.constant 0 : index
      %24 = vector.load %arg4[%c0_21, %c0_22] : memref<4x32xf32, #tpu.memory_space<vmem>>, vector<4x32xf32>
      %cst_23 = arith.constant dense<0.000000e+00> : vector<1x32xf32>
      %25 = tpu.matmul %23, %24, %cst_23 {dimension_numbers = #tpu.dot_dimension_numbers<[1], [0], [0], [1], [0, 0, 1, 1], [], []>} : vector<1x4xf32>, vector<4x32xf32>, vector<1x32xf32> -> vector<1x32xf32>
      %c0_24 = arith.constant 0 : index
      %c0_25 = arith.constant 0 : index
      %26 = vector.load %arg6[%c0_24, %c0_25] : memref<1x32xf32, #tpu.memory_space<vmem>>, vector<1x32xf32>
      %27 = arith.addf %25, %26 : vector<1x32xf32>
      %c0_26 = arith.constant 0 : index
      %c0_27 = arith.constant 0 : index
      %c0_28 = arith.constant 0 : index
      %28 = vector.load %arg8[%c0_26, %c0_27, %c0_28] : memref<1x1x32xf32, #tpu.memory_space<vmem>>, vector<1x1x32xf32>
      %29 = vector.shape_cast %28 : vector<1x1x32xf32> to vector<1x32xf32>
      %30 = vector.shape_cast %27 : vector<1x32xf32> to vector<1x1x32xf32>
      tpu.vector_store %arg8[%c0_26, %c0_27, %c0_28], %30 {strides = array<i32>} : memref<1x1x32xf32, #tpu.memory_space<vmem>>, vector<1x1x32xf32>,
    } else {
    }
    return
  }
  func.func @transform_0(%arg0: i32, %arg1: i32) -> (i32, i32, i32) {
    %c0_i32 = arith.constant 0 : i32
    %c0_i32_0 = arith.constant 0 : i32
    return %arg0, %c0_i32, %arg1 : i32, i32, i32
  }
  func.func @transform_1(%arg0: i32, %arg1: i32) -> (i32, i32) {
    %c0_i32 = arith.constant 0 : i32
    %c0_i32_0 = arith.constant 0 : i32
    %c0_i32_1 = arith.constant 0 : i32
    return %c0_i32, %c0_i32_0 : i32, i32
  }
  func.func @transform_2(%arg0: i32, %arg1: i32) -> (i32, i32) {
    %c0_i32 = arith.constant 0 : i32
    %c0_i32_0 = arith.constant 0 : i32
    %c0_i32_1 = arith.constant 0 : i32
    return %c0_i32, %c0_i32_0 : i32, i32
  }
  func.func @transform_3(%arg0: i32, %arg1: i32) -> (i32, i32) {
    %c0_i32 = arith.constant 0 : i32
    %c0_i32_0 = arith.constant 0 : i32
    %c0_i32_1 = arith.constant 0 : i32
    return %c0_i32, %c0_i32_0 : i32, i32
  }
  func.func @transform_4(%arg0: i32, %arg1: i32) -> (i32, i32) {
    %c0_i32 = arith.constant 0 : i32
    %c0_i32_0 = arith.constant 0 : i32
    %c0_i32_1 = arith.constant 0 : i32
    return %c0_i32, %c0_i32_0 : i32, i32
  }
  func.func @transform_5(%arg0: i32, %arg1: i32) -> (i32, i32, i32) {
    %c0_i32 = arith.constant 0 : i32
    %c0_i32_0 = arith.constant 0 : i32
    return %arg0, %c0_i32, %arg1 : i32, i32, i32
  }
  func.func @transform_6(%arg0: i32, %arg1: i32) -> (i32, i32, i32) {
    %c0_i32 = arith.constant 0 : i32
    %c0_i32_0 = arith.constant 0 : i32
    %c0_i32_1 = arith.constant 0 : i32
    return %arg0, %c0_i32, %c0_i32_0 : i32, i32, i32
  }
}

</mosaic_0001>

<bundles_post_ra>
// kernel: tpu_custom_call.1
= control target key start
LH: loop header
LB: loop body
LE: loop exit
PB: predicated region body
PF: predicated region fallthrough
CT: control target
= control target key end

     0   :  { %12 = vsyncpa [#allocation4], 0  ;;  %s1202_s0 = inlined_call_operand.vmem [shape: f32[2,4,256], index: 0, kind: input, shape index: {}]   ;;  %s1203_s1 = inlined_call_operand.vmem [shape: f32[32,4], index: 1, kind: input, shape index: {}]   ;;  %s1204_s2 = inlined_call_operand.vmem [shape: f32[4,32], index: 2, kind: input, shape index: {}]   ;;  %s1205_s3 = inlined_call_operand.vmem [shape: f32[32,1], index: 3, kind: input, shape index: {}]   ;;  %s1206_s4 = inlined_call_operand.vmem [shape: f32[1,32], index: 4, kind: input, shape index: {}]   ;;  %s1207_s5 = inlined_call_operand.hbm [shape: f32[2,32,256], index: 5, kind: output, shape index: {0}]   ;;  %s1208_s6 = inlined_call_operand.hbm [shape: f32[2,1,32], index: 6, kind: output, shape index: {1}]  }
   0x1   :  { %14 = vsyncpa [#allocation4 + $0x1], 0 }
   0x2   :  { %15 = vsyncpa [#allocation6], 0 }
   0x3   :  { %17 = vsyncpa [#allocation6 + $0x1], 0  ;;  %s1000_s21 = smov 0   ;;  %s1002_s22 = smov 0  }
   0x4   :  { %s1004_s23 = smov 0   ;;  %s1006_s24 = smov 0  }
   0x5   :  { %s1008_s25 = smov 0   ;;  %s1010_s26 = smov 0  }
   0x6 LB: > { %s743_s27 = sadd.s32 4294967295, %s955_s26   ;;  %s744_s28 = sadd.s32 4294967294, %s955_s26   ;;  %s955_s26 = sphi %s1010_s26, %s23_s26   ;;  %s951_s25 = sphi %s1008_s25, %s1215_s25   ;;  %s947_s24 = sphi %s1006_s24, %s1214_s24   ;;  %s943_s23 = sphi %s1004_s23, %s1213_s23   ;;  %s939_s22 = sphi %s1002_s22, %s1212_s22   ;;  %s935_s21 = sphi %s1000_s21, %s1211_s21  }
   0x7   : > { %s35_s29 = sadd.s32 1, %s951_s25  ;;  %s156_s30 = sadd.s32 1, %s943_s23 }
   0x8   : > { %p37_p0 = scmp.ge.s32.totalorder %s35_s29, 2  ;;  %p166_p1 = scmp.ne.s32.totalorder %s943_s23, %s939_s22 }
   0x9   : > { %p167_p2 = scmp.eq.s32.totalorder %s743_s27, 1  ;;  %p172_p3 = scmp.ne.s32.totalorder %s939_s22, %s935_s21 }
   0xa   : > { %s1217_s29 = smov (%p37_p0, %s35_s29), 0  ;;  %p173_p5 = scmp.eq.s32.totalorder %s744_s28, 1 }
   0xb   : > { %p1040_p4 = por %p167_p2, %p166_p1  ;;  %s151_s8 = ssub.s32 %s951_s25, %s1217_s29 }
   0xc   : > { %p747_p6 = scmp.ge.s32.totalorder %s955_s26, 1  ;;  %p154_p7 = scmp.eq.s32.totalorder %s151_s8, 0 }
   0xd   : > { %p1047_p8 = por %p173_p5, %p172_p3  ;;  %p242_p9 = scmp.lt.s32.totalorder %s955_s26, 3 }
   0xe   : > { %s1053_s10 = scalar_select %p154_p7, %s943_s23, %s156_s30  }
   0xf   : > { %p243_p10 = pnand %p747_p6, %p242_p9 }
  0x10   : > { %p281_p11 = scmp.lt.s32.totalorder (!%p243_p10), %s947_s24, 1  ;;  %v957_v0 = vmov (!%p243_p10), 0.0   ;;  %v304_v1 = vld [vmem:[%s1205_s3 + $0x10] sm:$0xff] (!%p243_p10)  ;;  %v958_v2 = vmov (!%p243_p10), 0   ;;  %v305_v3 = vld [vmem:[%s1205_s3 + $0x18] sm:$0xff] (!%p243_p10)  ;;  %vm341_vm0 = vcmask (!%p243_p10), 1043456  }
  0x11   : > { %246 = sbr.rel (%p243_p10) target bundleno = 494 (0x1ee), region = 40  ;;  %428 = vmatprep.mubr.f32.mxu1 (!%p243_p10), %v957_v0  ;;  %410 = vmatprep.mubr.f32.mxu0 (!%p243_p10), %v957_v0  ;;  %v301_v6 = vld [vmem:[%s1203_s1 + $0x18] sm:$0xff] (!%p243_p10)  ;;  %vm328_vm1 = vcmask (!%p243_p10), 31744   ;;  %v959_v7 = vmov (!%p243_p10), 1.0   ;;  %vm295_vm2 = vcmask (!%p243_p10), 24576   ;;  %v298_v8 = vld [vmem:[%s1203_s1] sm:$0xff] (!%p243_p10) }
  0x12   : > { %843 = vset.pattern.permute.xlu1 (!%p243_p10), %v958_v2  ;;  %842 = vset.pattern.permute.xlu0 (!%p243_p10), %v958_v2  ;;  %296 = vst.msk [vmem:[#allocation2] sm:$0x1] (!%p243_p10), %vm295_vm2, %v957_v0  ;;  %v299_v9 = vld [vmem:[%s1203_s1 + $0x8] sm:$0xff] (!%p243_p10)  ;;  %v523_v10 = vld [vmem:[%s1204_s2] sm:$0xf] (!%p243_p10)  ;;  %v300_v11 = vld [vmem:[%s1203_s1 + $0x10] sm:$0xff] (!%p243_p10) }
  0x13   : > { %318 = vperm.xlu1 (!%p243_p10), %843, %v304_v1   ;;  %vm960_vm3 = vmmov (!%p243_p10), 0   ;;  %v302_v12 = vld [vmem:[%s1205_s3] sm:$0xff] (!%p243_p10)  ;;  %v303_v13 = vld [vmem:[%s1205_s3 + $0x8] sm:$0xff] (!%p243_p10)  ;;  %s1098_s20 = sand.u32 (!%p243_p10), 1, %s939_s22   ;;  %s766_s30 = sshll.u32 (!%p243_p10), %s947_s24, 10 }
  0x14   : > { %308 = vperm.xlu0 (!%p243_p10), %842, %v302_v12   ;;  %s748_s27 = sshll.u32 (!%p243_p10), %s1098_s20, 6  ;;  %s961_s16 = smov (!%p243_p10), [#allocation3]  }
  0x15   : > { %s1101_s28 = scalar_lea.vmem (!%p243_p10), [#allocation3], %s748_s27  ;;  %s849_s17 = sshll.u32 (!%p243_p10), %s961_s16, 4  ;;  %s850_s17 = int_to_ptr.vmem [resolvable:$false] %s849_s17 }
  0x16   : > { %s623_s8 = sshll.u32 (!%p243_p10), %s1101_s28, 4  ;;  %s851_s18 = scalar_lea.vmem (!%p243_p10), %s850_s17, 2048  ;;  %s1120_s8 = int_to_ptr.vmem [resolvable:$true] %s623_s8 }
  0x17   : > { %323 = vperm.xlu1 (!%p243_p10), %843, %v305_v3   ;;  %s845_s15 = scalar_lea.vmem (!%p243_p10), %s1120_s8, 1024  ;;  %p852_p1 = scmp.lt.s32.totalorder (!%p243_p10), %s1120_s8, %s850_s17 }
  0x18   : > { %s282_s13 = scalar_select %p281_p11, %s947_s24, 1  ;;  %313 = vperm.xlu0 %842, %v303_v13  }
  0x19   : > { %v514_v20 = vld [vmem:[#allocation2] sm:$0x1]  ;;  %p846_p12 = scmp.ne.s32.totalorder %s1120_s8, %s845_s15  ;;  %p853_p2 = scmp.lt.s32.totalorder %s851_s18, %s845_s15 }
  0x1a   : > { %s765_s14 = sshll.u32 %s282_s13, 3  ;;  %s1118_s13 = scalar_lea.hbm %s1207_s5, %s766_s30 }
  0x1b   : > { %s288_s19 = scalar_lea.vmem %s1202_s0, %s765_s14  ;;  %s604_s14 = scalar_lea.sflag [#allocation4], %s1098_s20 }
  0x1c   : > { %v297_v4 = vld [vmem:[%s288_s19] sm:$0xff]  ;;  %p847_p13 = pnand %p846_p12, %p1040_p4  ;;  %p854_p3 = por %p853_p2, %p852_p1 }
  0x1d   : > { %v327_v5 = vcombine.high %v297_v4, %v297_v4 }
  0x1e   : > { %p848_p0 = pneg %p847_p13 }
  0x1f   : > { %774 = vmatprep.subr.msk.mxu1 %vm341_vm0, %v327_v5  ;;  %751 = vmatprep.subr.msk.mxu0 %vm341_vm0, %v327_v5 }
  0x20   : > { %775 = vmatpush1.msk.msra.mxu1 %vm341_vm0, %v297_v4  ;;  %752 = vmatpush1.msk.msra.mxu0 %vm341_vm0, %v297_v4  ;;  %p855_p5 = pnand %p854_p3, %p848_p0 }
  0x21   : > { %756 = vmatmul.mubr.msk.f32.vlgmr.msra.gmra.mrb[0].mxu1 %vm328_vm1, %v301_v6  ;;  %444 = vmatprep.subr.mxu1 %v327_v5 }
  0x22   : > { %508 = vmatprep.mubr.f32.mxu1 %v959_v7  ;;  %753 = vmatmul.mubr.msk.f32.vlgmr.msra.gmra.mrb[0].mxu0 %vm328_vm1, %v298_v8 }
  0x23   : > { %416 = vmatprep.mubr.f32.mxu0 %v957_v0 }
  0x26   : > { %754 = vmatmul.mubr.msk.f32.gmra.mrb[2].mxu0 %vm328_vm1, %v299_v9 }
  0x27   : > { %445 = vmatpush1.xpose.msra.mxu1 %v297_v4  ;;  %422 = vmatprep.mubr.f32.mxu0 %v957_v0 }
  0x28   : > { %769 = vmatprep.subr.mxu1 %v957_v0 }
  0x2a   : > { %509 = vmatmul.mubr.f32.vlgmr.msra.gmra.mrb[2].mxu1 %v959_v7  ;;  %755 = vmatmul.mubr.msk.f32.gmra.mrb[4].mxu0 %vm328_vm1, %v300_v11 }
  0x2b   : > { %770 = vmatpush3.msk.msra.mxu1 %vm341_vm0, %v523_v10  ;;  %771 = vmatprep.mubr.msk.f32.mxu1 %vm960_vm3, %v957_v0 }
  0x92   : > { %v319_v14 = vpop.permute.xlu1 %318 }
  0x93   : > { %v309_v26 = vpop.permute.xlu0 %308 }
  0x96   : > { %v324_v15 = vpop.permute.xlu1 %323 }
  0x97   : > { %v314_v31 = vpop.permute.xlu0 %313 }
  0xf4   : > { %v430_v16 = vpop.f32.mrb[0].mxu1 }
  0xf5   : > { %v431_v17 = vadd.f32 %v430_v16, %v324_v15  ;;  %v432_v18 = vpop.f32.mrb[1].mxu1  ;;  %v412_v27 = vpop.f32.mrb[0].mxu0 }
  0xf6   : > { %v433_v19 = vadd.f32 %v432_v18, %v324_v15  ;;  %v413_v28 = vadd.f32 %v412_v27, %v309_v26  ;;  %v414_v29 = vpop.f32.mrb[1].mxu0 }
  0xf7   : > { %441 = vst [vmem:[%s1101_s28 + $0x30] sm:$0xff] %v431_v17  ;;  %v415_v30 = vadd.f32 %v414_v29, %v309_v26 }
  0xf8   : > { %442 = vst [vmem:[%s1101_s28 + $0x38] sm:$0xff] %v433_v19  ;;  %435 = vst [vmem:[%s1101_s28] sm:$0xff] %v413_v28 }
  0xf9   : > { %436 = vst [vmem:[%s1101_s28 + $0x8] sm:$0xff] %v415_v30  ;;  %v418_v32 = vpop.f32.mrb[2].mxu0 }
  0xfa   : > { %v420_v33 = vpop.f32.mrb[3].mxu0  ;;  %v419_v34 = vadd.f32 %v418_v32, %v314_v31 }
  0xfb   : > { %v421_v35 = vadd.f32 %v420_v33, %v314_v31 }
  0xfc   : > { %437 = vst [vmem:[%s1101_s28 + $0x10] sm:$0xff] %v419_v34 }
  0xfd   : > { %v510_v21 = vpop.f32.mrb[2].mxu1  ;;  %438 = vst [vmem:[%s1101_s28 + $0x18] sm:$0xff] %v421_v35  ;;  %v424_v36 = vpop.f32.mrb[4].mxu0 }
  0xfe   : > { %v515_v22 = vadd.f32 %v514_v20, %v510_v21  ;;  %v512_v23 = vpop.f32.mrb[3].mxu1  ;;  %v425_v37 = vadd.f32 %v424_v36, %v319_v14  ;;  %v426_v38 = vpop.f32.mrb[5].mxu0 }
  0xff   : > { %v427_v39 = vadd.f32 %v426_v38, %v319_v14 }
 0x100   : > { %517 = vst.msk [vmem:[#allocation2] sm:$0x1] %vm295_vm2, %v515_v22  ;;  %439 = vst [vmem:[%s1101_s28 + $0x20] sm:$0xff] %v425_v37 }
 0x101   : > { %440 = vst [vmem:[%s1101_s28 + $0x28] sm:$0xff] %v427_v39 }
 0x107   : > { %v521_v24 = vld [vmem:[#allocation2] sm:$0x1] }
 0x108   : > { %v522_v25 = vmul.f32 0.00390625, %v521_v24 }
 0x10a   : > { %772 = vmatmul.mubr.msk.f32.vlgmr.msra.gmra.mrb[4].mxu1 %vm328_vm1, %v522_v25 }
 0x10b   : > { %858 = shalt.err (!%p855_p5)
}
 0x10c   : > { %s859_s19 = scalar_lea.hbm %s1118_s13, 1024  ;;  %s863_s30 = scalar_lea.hbm %s1207_s5, 2048 }
 0x10d   : > { %p860_p6 = scmp.ne.s32.totalorder %s1118_s13, %s859_s19  ;;  %p864_p10 = scmp.lt.u32.totalorder %s1118_s13, %s1207_s5 }
 0x10e   : > { %p865_p11 = scmp.lt.u32.totalorder %s863_s30, %s859_s19  ;;  %p867_p13 = scmp.lt.u32.totalorder %s859_s19, %s1118_s13 }
 0x10f   : > { %p861_p7 = pnand %p860_p6, %p1040_p4 }
 0x110   : > { %p866_p12 = por %p865_p11, %p864_p10 }
 0x111   : > { %p862_p9 = pneg %p861_p7 }
 0x112   : > { %p868_p0 = por %p867_p13, %p866_p12 }
 0x114   : > { %p869_p1 = pnand %p868_p0, %p862_p9 }
 0x116   : > { %872 = shalt.err (!%p869_p1)
}
 0x117   : > { %s962_s15 = smov 256   ;;  %s963_s16 = smov 16   ;;  %v524_v40 = vld [vmem:[%s1206_s4] sm:$0x1]  ;;  %vm601_vm4 = vcmask 253952  }
 0x118   : > { %776 = dma.vmem_to_hbm [thread:$0]  (%p1040_p4), %s1120_s8, 1024, %s1118_s13, %s604_s14, %s962_s15, %s962_s15, %s963_s16  }
 0x119   : > { %s762_s19 = sshll.u32 %s947_s24, 4  ;;  %s279_s27 = scalar_lea.vmem [#allocation5], %s1098_s20 }
 0x11a   : > { %s639_s28 = sshll.u32 %s279_s27, 4  ;;  %s1154_s12 = scalar_lea.hbm %s1208_s6, %s762_s19  ;;  %s1156_s28 = int_to_ptr.vmem [resolvable:$true] %s639_s28 }
 0x11b   : > { %s609_s8 = scalar_lea.sflag [#allocation6], %s1098_s20  ;;  %s873_s13 = scalar_lea.vmem %s1156_s28, 16 }
 0x11c   : > { %p874_p2 = scmp.ne.s32.totalorder %s1156_s28, %s873_s13  ;;  %s964_s24 = smov [#allocation5]  }
 0x11d   : > { %s877_s14 = sshll.u32 %s964_s24, 4  ;;  %s878_s14 = int_to_ptr.vmem [resolvable:$false] %s877_s14 }
 0x11e   : > { %p875_p3 = pnand %p874_p2, %p1040_p4  ;;  %s879_s15 = scalar_lea.vmem %s878_s14, 32 }
 0x11f   : > { %p880_p6 = scmp.lt.s32.totalorder %s1156_s28, %s878_s14  ;;  %p881_p7 = scmp.lt.s32.totalorder %s879_s15, %s873_s13 }
 0x120   : > { %p876_p5 = pneg %p875_p3 }
 0x121   : > { %p882_p9 = por %p881_p7, %p880_p6 }
 0x123   : > { %p883_p10 = pnand %p882_p9, %p876_p5 }
 0x1dd   : > { %v597_v41 = vpop.f32.mrb[4].mxu1 }
 0x1de   : > { %v598_v42 = vadd.f32 %v597_v41, %v524_v40  ;;  %v773_v43 = vpop.f32.mrb[5].mxu1 }
 0x1e0   : > { %602 = vst.msk [vmem:[%s279_s27] sm:$0x1] %vm601_vm4, %v598_v42 }
 0x1e1   : > { %886 = shalt.err (!%p883_p10)
}
 0x1e2   : > { %s887_s20 = scalar_lea.hbm %s1154_s12, 16  ;;  %s891_s18 = scalar_lea.hbm %s1208_s6, 32 }
 0x1e3   : > { %p888_p11 = scmp.ne.s32.totalorder %s1154_s12, %s887_s20  ;;  %p892_p0 = scmp.lt.u32.totalorder %s1154_s12, %s1208_s6 }
 0x1e4   : > { %p893_p1 = scmp.lt.u32.totalorder %s891_s18, %s887_s20  ;;  %p895_p3 = scmp.lt.u32.totalorder %s887_s20, %s1154_s12 }
 0x1e5   : > { %p889_p12 = pnand %p888_p11, %p1040_p4 }
 0x1e6   : > { %p894_p2 = por %p893_p1, %p892_p0 }
 0x1e7   : > { %p890_p13 = pneg %p889_p12 }
 0x1e8   : > { %p896_p5 = por %p895_p3, %p894_p2 }
 0x1ea   : > { %p897_p6 = pnand %p896_p5, %p890_p13 }
 0x1ec   : > { %900 = shalt.err (!%p897_p6)
}
 0x1ed   : > { %777 = dma.vmem_to_hbm [thread:$0]  (%p1040_p4), %s1156_s28, 16, %s1154_s12, %s609_s8  }
 0x1ee PF: > { %p787_p7 = scmp.ge.s32.totalorder %s955_s26, 2  ;;  %s651_s30 = sand.u32 1, %s935_s21  }
 0x1ef   : > { %s652_s11 = scalar_lea.sflag [#allocation4], %s651_s30 }
 0x1f0   : > { %p781_p9 = pnand %p787_p7, %p1047_p8 }
 0x1f2   : > { %926 = dma.done.wait (!%p781_p9), %s652_s11, 1024  }
 0x1f3   : > { %928 = vsyncadd (!%p781_p9), %s652_s11, 4294966272  ;;  %s661_s13 = scalar_lea.sflag [#allocation6], %s651_s30 }
 0x1f4   : > { %930 = dma.done.wait (!%p781_p9), %s661_s13, 16  }
 0x1f5   : > { %932 = vsyncadd (!%p781_p9), %s661_s13, 4294967280  ;;  %s23_s26 = sadd.s32 1, %s955_s26   ;;  %s1211_s21 = smov %s939_s22 }
 0x1f6   : > { %p20_p10 = scmp.ge.s32.totalorder %s23_s26, 4   ;;  %s1212_s22 = smov %s943_s23 }
 0x1f7   : > { %s1213_s23 = smov %s1053_s10  ;;  %s1214_s24 = smov %s951_s25 }
 0x1f8   : > { %s1215_s25 = smov %s1217_s29  ;;  %22 = sbr.rel (!%p20_p10) target bundleno = 6 (0x6), region = 100 }
 0x1ff   :  { %665 = vsyncpa [#allocation4], 1 }
 0x200   :  { %667 = vsyncpa [#allocation4 + $0x1], 1 }
 0x201   :  { %668 = vsyncpa [#allocation6], 1 }
 0x202   :  { %670 = vsyncpa [#allocation6 + $0x1], 1 }

</bundles_post_ra>
